<compile_context>
chip_gen: v6e
topology: v6e:2x2x1
jax: 0.10.0
libtpu: 0.0.40
codegen_flags: <defaults>
</compile_context>

<pallas_src>
import jax
import jax.numpy as jnp
from jax.experimental import pallas as pl
from jax.experimental.pallas import tpu as pltpu


# ----------------------------------------------------------------------------
# Fused EncodingBlock kernels
# ----------------------------------------------------------------------------

def _double_conv(x, m1_ref, b1_ref, m2_ref, b2_ref, u, d):
    """Two fused 3x3 'same' convs (+bias+ReLU) on a lane-dense (H, W*C) tile.

    conv(inp) = relu( U @ (inp @ M0) + inp @ M1 + D @ (inp @ M2) + b )
    where M_dh are banded (W*Cin, W*Cout) matrices for kernel row dh (with the
    W-direction zero padding folded in) and U / D are (H, H) shift-by-one
    matrices (zero fill) implementing the H-direction zero padding.
    """
    def conv(inp, m_ref, b_ref):
        p0 = jnp.dot(inp, m_ref[0], preferred_element_type=jnp.float32)
        p1 = jnp.dot(inp, m_ref[1], preferred_element_type=jnp.float32)
        p2 = jnp.dot(inp, m_ref[2], preferred_element_type=jnp.float32)
        pre = (jnp.dot(u, p0, preferred_element_type=jnp.float32)
               + p1
               + jnp.dot(d, p2, preferred_element_type=jnp.float32)
               + b_ref[...])
        return jnp.maximum(pre, 0.0)

    h1 = conv(x, m1_ref, b1_ref)          # stays on-chip, never written to HBM
    return conv(h1, m2_ref, b2_ref)       # (H, W*Cout)


def _block_kernel_pool(x_ref, m1_ref, b1_ref, m2_ref, b2_ref, ud_ref,
                       selh_ref, selw_ref, res_ref, out_ref):
    x = x_ref[0]                                            # (H, W*Cin)
    h2 = _double_conv(x, m1_ref, b1_ref, m2_ref, b2_ref, ud_ref[0], ud_ref[1])
    res_ref[0] = h2                                         # residual, lane-dense
    # Fused 2x2 max-pool: row/column gathers as 0/1 selection matmuls + max.
    rows = jnp.maximum(
        jnp.dot(selh_ref[0], h2, preferred_element_type=jnp.float32),
        jnp.dot(selh_ref[1], h2, preferred_element_type=jnp.float32))
    out_ref[0] = jnp.maximum(
        jnp.dot(rows, selw_ref[0], preferred_element_type=jnp.float32),
        jnp.dot(rows, selw_ref[1], preferred_element_type=jnp.float32))


def _block_kernel_nopool(x_ref, m1_ref, b1_ref, m2_ref, b2_ref, ud_ref, res_ref):
    x = x_ref[0]
    res_ref[0] = _double_conv(x, m1_ref, b1_ref, m2_ref, b2_ref,
                              ud_ref[0], ud_ref[1])


# ----------------------------------------------------------------------------
# Wrapper: one pallas_call per EncodingBlock
# ----------------------------------------------------------------------------

def _banded_matrices(w, W):
    """w: (3, 3, Cin, Cout) -> (3, W*Cin, W*Cout) banded per-kernel-row matrices.

    M_dh[w_in*Cin + c, w_out*Cout + o] = w[dh, dw, c, o] with dw = w_in - w_out + 1
    (zero outside the band == implicit 'same' zero padding along W)."""
    cin, cout = int(w.shape[2]), int(w.shape[3])
    mats = []
    for dh in range(3):
        m = jnp.zeros((W * cin, W * cout), jnp.float32)
        for dw in range(3):
            m = m + jnp.kron(jnp.eye(W, k=1 - dw, dtype=jnp.float32),
                             w[dh, dw].astype(jnp.float32))
        mats.append(m)
    return jnp.stack(mats, axis=0)


def encoding_block_apply(x_nhwc, p):
    """One EncodingBlock. x_nhwc: (N,H,W,Cin) -> (block_out, residual), NHWC."""
    N, H, W, Cin = x_nhwc.shape
    Cout = int(p["w1"].shape[-1])
    pooling = p["pooling"]
    f32 = jnp.float32

    m1 = _banded_matrices(p["w1"], W)                        # (3, W*Cin, W*Cout)
    m2 = _banded_matrices(p["w2"], W)                        # (3, W*Cout, W*Cout)
    b1r = jnp.tile(p["b1"].astype(f32), W).reshape(1, W * Cout)
    b2r = jnp.tile(p["b2"].astype(f32), W).reshape(1, W * Cout)
    ud = jnp.stack([jnp.eye(H, k=-1, dtype=f32),             # picks row h-1 (zero fill)
                    jnp.eye(H, k=1, dtype=f32)])             # picks row h+1 (zero fill)

    x2d = x_nhwc.reshape(N, H, W * Cin)                      # free row-major reshape

    in_specs = [
        pl.BlockSpec((1, H, W * Cin), lambda n: (n, 0, 0)),
        pl.BlockSpec((3, W * Cin, W * Cout), lambda n: (0, 0, 0)),
        pl.BlockSpec((1, W * Cout), lambda n: (0, 0)),
        pl.BlockSpec((3, W * Cout, W * Cout), lambda n: (0, 0, 0)),
        pl.BlockSpec((1, W * Cout), lambda n: (0, 0)),
        pl.BlockSpec((2, H, H), lambda n: (0, 0, 0)),
    ]
    args = [x2d, m1, b1r, m2, b2r, ud]
    compiler_params = pltpu.CompilerParams(
        dimension_semantics=("parallel",),
        vmem_limit_bytes=48 * 1024 * 1024)

    if pooling:
        Hh, Wh = H // 2, W // 2
        eye_h = jnp.eye(H, dtype=f32)
        selh = jnp.stack([eye_h[0::2, :], eye_h[1::2, :]])           # (2, Hh, H)
        eye_w = jnp.eye(W, dtype=f32)
        eye_c = jnp.eye(Cout, dtype=f32)
        selw = jnp.stack([jnp.kron(eye_w[:, 0::2], eye_c),
                          jnp.kron(eye_w[:, 1::2], eye_c)])          # (2, W*C, Wh*C)
        in_specs += [
            pl.BlockSpec((2, Hh, H), lambda n: (0, 0, 0)),
            pl.BlockSpec((2, W * Cout, Wh * Cout), lambda n: (0, 0, 0)),
        ]
        args += [selh, selw]

        res2d, out2d = pl.pallas_call(
            _block_kernel_pool,
            out_shape=(jax.ShapeDtypeStruct((N, H, W * Cout), f32),
                       jax.ShapeDtypeStruct((N, Hh, Wh * Cout), f32)),
            grid=(N,),
            in_specs=in_specs,
            out_specs=(pl.BlockSpec((1, H, W * Cout), lambda n: (n, 0, 0)),
                       pl.BlockSpec((1, Hh, Wh * Cout), lambda n: (n, 0, 0))),
            compiler_params=compiler_params,
        )(*args)
        residual = res2d.reshape(N, H, W, Cout)
        return out2d.reshape(N, Hh, Wh, Cout), residual

    res2d = pl.pallas_call(
        _block_kernel_nopool,
        out_shape=jax.ShapeDtypeStruct((N, H, W * Cout), f32),
        grid=(N,),
        in_specs=in_specs,
        out_specs=pl.BlockSpec((1, H, W * Cout), lambda n: (n, 0, 0)),
        compiler_params=compiler_params,
    )(*args)
    residual = res2d.reshape(N, H, W, Cout)
    return residual, residual


# ----------------------------------------------------------------------------
# Encoder: parameter init + forward (mirrors the PyTorch module)
# ----------------------------------------------------------------------------

def _init_conv(key, cin, cout):
    # Matches PyTorch nn.Conv2d defaults: kaiming_uniform(a=sqrt(5)) for the
    # weight and U(+-1/sqrt(fan_in)) for the bias.
    kw, kb = jax.random.split(key)
    fan_in = 3 * 3 * cin
    bound = float(fan_in) ** -0.5
    w = jax.random.uniform(kw, (3, 3, cin, cout), jnp.float32, -bound, bound)
    b = jax.random.uniform(kb, (cout,), jnp.float32, -bound, bound)
    return w, b


def init_encoder_params(key, input_channels, depth, filters):
    blocks = []
    keys = jax.random.split(key, depth + 1)
    num_filters_out = filters
    for i in range(depth):
        if i == 0:
            num_filters_in = input_channels
        else:
            num_filters_in = num_filters_out
            num_filters_out *= 2
        k1, k2 = jax.random.split(keys[i])
        w1, b1 = _init_conv(k1, num_filters_in, num_filters_out)
        w2, b2 = _init_conv(k2, num_filters_out, num_filters_out)
        blocks.append(dict(w1=w1, b1=b1, w2=w2, b2=b2, pooling=True))
    num_filters_in = num_filters_out
    num_filters_out *= 2
    k1, k2 = jax.random.split(keys[depth])
    w1, b1 = _init_conv(k1, num_filters_in, num_filters_out)
    w2, b2 = _init_conv(k2, num_filters_out, num_filters_out)
    blocks.append(dict(w1=w1, b1=b1, w2=w2, b2=b2, pooling=False))
    return blocks


def encoder_apply(x_nchw, blocks):
    """Matches Encoder.forward: returns (x, [residuals]) in NCHW."""
    x = jnp.transpose(x_nchw, (0, 2, 3, 1)).astype(jnp.float32)   # NCHW -> NHWC once
    residuals_nhwc = []
    for p in blocks:
        x, residual = encoding_block_apply(x, p)
        residuals_nhwc.append(residual)
    # Back to NCHW only once per returned tensor, at the API boundary.
    x_out = jnp.transpose(x, (0, 3, 1, 2))
    residuals = [jnp.transpose(r, (0, 3, 1, 2)) for r in residuals_nhwc]
    return x_out, residuals


# ----------------------------------------------------------------------------
# Pure-JAX reference (for a loose numerical sanity check)
# ----------------------------------------------------------------------------

def _reference_encoder(x_nchw, blocks):
    x = jnp.transpose(x_nchw, (0, 2, 3, 1)).astype(jnp.float32)
    residuals = []
    for p in blocks:
        def conv(v, w, b):
            y = jax.lax.conv_general_dilated(
                v, w.astype(jnp.float32), (1, 1), "SAME",
                dimension_numbers=("NHWC", "HWIO", "NHWC"),
                precision=jax.lax.Precision.HIGHEST)
            return jax.nn.relu(y + b)
        h = conv(x, p["w1"], p["b1"])
        h = conv(h, p["w2"], p["b2"])
        res = h
        if p["pooling"]:
            n, hh, ww, c = h.shape
            h = h.reshape(n, hh // 2, 2, ww // 2, 2, c).max(axis=(2, 4))
        residuals.append(jnp.transpose(res, (0, 3, 1, 2)))
        x = h
    return jnp.transpose(x, (0, 3, 1, 2)), residuals


# ----------------------------------------------------------------------------
# Demo
# ----------------------------------------------------------------------------

if __name__ == "__main__":
    # config: input_dim = (16, 16, 4) (channels-last; input_dim[-1] == Cin),
    # depth = 2, filters = 8.
    N, Cin, H, W = 2, 4, 16, 16
    depth, filters = 2, 8

    root = jax.random.PRNGKey(0)
    kx, kp = jax.random.split(root)
    x_nchw = jax.random.normal(kx, (N, Cin, H, W), jnp.float32)
    params = init_encoder_params(kp, input_channels=Cin, depth=depth, filters=filters)

    x_out, residuals = encoder_apply(x_nchw, params)
    x_out = jax.block_until_ready(x_out)
    for r in residuals:
        jax.block_until_ready(r)

    # expected shapes (NCHW):
    #   residuals: (2,8,16,16), (2,16,8,8), (2,32,4,4); x_out: (2,32,4,4)
    assert x_out.shape == (N, filters * (2 ** depth), H // (2 ** depth), W // (2 ** depth))
    assert residuals[0].shape == (N, filters, H, W)
    assert residuals[1].shape == (N, 2 * filters, H // 2, W // 2)
    assert residuals[2].shape == (N, 4 * filters, H // 4, W // 4)

    # loose numerical check against a pure-JAX reference
    ref_out, ref_res = _reference_encoder(x_nchw, params)
    max_diff = float(jnp.max(jnp.abs(x_out - ref_out)))
    for a, b in zip(residuals, ref_res):
        max_diff = max(max_diff, float(jnp.max(jnp.abs(a - b))))
    assert max_diff < 1e-1, f"mismatch vs reference: {max_diff}"

    print("KERNEL_OK")
</pallas_src>

<mosaic_0001>
module attributes {stable_mosaic.version = 11 : i64} {
  func.func @_block_kernel_pool(%arg0: i32, %arg1: memref<1x16x64xf32, #tpu.memory_space<vmem>>, %arg2: memref<3x64x128xf32, #tpu.memory_space<vmem>>, %arg3: memref<1x128xf32, #tpu.memory_space<vmem>>, %arg4: memref<3x128x128xf32, #tpu.memory_space<vmem>>, %arg5: memref<1x128xf32, #tpu.memory_space<vmem>>, %arg6: memref<2x16x16xf32, #tpu.memory_space<vmem>>, %arg7: memref<2x8x16xf32, #tpu.memory_space<vmem>>, %arg8: memref<2x128x64xf32, #tpu.memory_space<vmem>>, %arg9: memref<1x16x128xf32, #tpu.memory_space<vmem>>, %arg10: memref<1x8x64xf32, #tpu.memory_space<vmem>>) attributes {dimension_semantics = [#tpu.dimension_semantics<parallel>], iteration_bounds = array<i64: 2>, scalar_prefetch = 0 : i64, scratch_operands = 0 : i64, tpu.core_type = #tpu.core_type<tc>, window_params = [{transform_indices = @transform_0, window_bounds = array<i64: 1, 16, 64>}, {pipeline_mode = #tpu.pipeline_mode<synchronous>, transform_indices = @transform_1, window_bounds = array<i64: 3, 64, 128>}, {pipeline_mode = #tpu.pipeline_mode<synchronous>, transform_indices = @transform_2, window_bounds = array<i64: 1, 128>}, {pipeline_mode = #tpu.pipeline_mode<synchronous>, transform_indices = @transform_3, window_bounds = array<i64: 3, 128, 128>}, {pipeline_mode = #tpu.pipeline_mode<synchronous>, transform_indices = @transform_4, window_bounds = array<i64: 1, 128>}, {pipeline_mode = #tpu.pipeline_mode<synchronous>, transform_indices = @transform_5, window_bounds = array<i64: 2, 16, 16>}, {pipeline_mode = #tpu.pipeline_mode<synchronous>, transform_indices = @transform_6, window_bounds = array<i64: 2, 8, 16>}, {pipeline_mode = #tpu.pipeline_mode<synchronous>, transform_indices = @transform_7, window_bounds = array<i64: 2, 128, 64>}, {transform_indices = @transform_8, window_bounds = array<i64: 1, 16, 128>}, {transform_indices = @transform_9, window_bounds = array<i64: 1, 8, 64>}]} {
    %c0 = arith.constant 0 : index
    %c0_0 = arith.constant 0 : index
    %c0_1 = arith.constant 0 : index
    %0 = vector.load %arg1[%c0, %c0_0, %c0_1] : memref<1x16x64xf32, #tpu.memory_space<vmem>>, vector<1x16x64xf32>
    %1 = vector.shape_cast %0 : vector<1x16x64xf32> to vector<16x64xf32>
    %c0_2 = arith.constant 0 : index
    %c0_3 = arith.constant 0 : index
    %c0_4 = arith.constant 0 : index
    %2 = vector.load %arg6[%c0_2, %c0_3, %c0_4] : memref<2x16x16xf32, #tpu.memory_space<vmem>>, vector<1x16x16xf32>
    %3 = vector.shape_cast %2 : vector<1x16x16xf32> to vector<16x16xf32>
    %c1 = arith.constant 1 : index
    %c0_5 = arith.constant 0 : index
    %c0_6 = arith.constant 0 : index
    %4 = vector.load %arg6[%c1, %c0_5, %c0_6] : memref<2x16x16xf32, #tpu.memory_space<vmem>>, vector<1x16x16xf32>
    %5 = vector.shape_cast %4 : vector<1x16x16xf32> to vector<16x16xf32>
    %c0_7 = arith.constant 0 : index
    %c0_8 = arith.constant 0 : index
    %c0_9 = arith.constant 0 : index
    %6 = vector.load %arg2[%c0_7, %c0_8, %c0_9] : memref<3x64x128xf32, #tpu.memory_space<vmem>>, vector<1x64x128xf32>
    %7 = vector.shape_cast %6 : vector<1x64x128xf32> to vector<64x128xf32>
    %cst = arith.constant dense<0.000000e+00> : vector<16x128xf32>
    %8 = tpu.matmul %1, %7, %cst {dimension_numbers = #tpu.dot_dimension_numbers<[1], [0], [0], [1], [0, 0, 1, 1], [], []>} : vector<16x64xf32>, vector<64x128xf32>, vector<16x128xf32> -> vector<16x128xf32>
    %c1_10 = arith.constant 1 : index
    %c0_11 = arith.constant 0 : index
    %c0_12 = arith.constant 0 : index
    %9 = vector.load %arg2[%c1_10, %c0_11, %c0_12] : memref<3x64x128xf32, #tpu.memory_space<vmem>>, vector<1x64x128xf32>
    %10 = vector.shape_cast %9 : vector<1x64x128xf32> to vector<64x128xf32>
    %cst_13 = arith.constant dense<0.000000e+00> : vector<16x128xf32>
    %11 = tpu.matmul %1, %10, %cst_13 {dimension_numbers = #tpu.dot_dimension_numbers<[1], [0], [0], [1], [0, 0, 1, 1], [], []>} : vector<16x64xf32>, vector<64x128xf32>, vector<16x128xf32> -> vector<16x128xf32>
    %c2 = arith.constant 2 : index
    %c0_14 = arith.constant 0 : index
    %c0_15 = arith.constant 0 : index
    %12 = vector.load %arg2[%c2, %c0_14, %c0_15] : memref<3x64x128xf32, #tpu.memory_space<vmem>>, vector<1x64x128xf32>
    %13 = vector.shape_cast %12 : vector<1x64x128xf32> to vector<64x128xf32>
    %cst_16 = arith.constant dense<0.000000e+00> : vector<16x128xf32>
    %14 = tpu.matmul %1, %13, %cst_16 {dimension_numbers = #tpu.dot_dimension_numbers<[1], [0], [0], [1], [0, 0, 1, 1], [], []>} : vector<16x64xf32>, vector<64x128xf32>, vector<16x128xf32> -> vector<16x128xf32>
    %cst_17 = arith.constant dense<0.000000e+00> : vector<16x128xf32>
    %15 = tpu.matmul %3, %8, %cst_17 {dimension_numbers = #tpu.dot_dimension_numbers<[1], [0], [0], [1], [0, 0, 1, 1], [], []>} : vector<16x16xf32>, vector<16x128xf32>, vector<16x128xf32> -> vector<16x128xf32>
    %16 = arith.addf %15, %11 : vector<16x128xf32>
    %cst_18 = arith.constant dense<0.000000e+00> : vector<16x128xf32>
    %17 = tpu.matmul %5, %14, %cst_18 {dimension_numbers = #tpu.dot_dimension_numbers<[1], [0], [0], [1], [0, 0, 1, 1], [], []>} : vector<16x16xf32>, vector<16x128xf32>, vector<16x128xf32> -> vector<16x128xf32>
    %18 = arith.addf %16, %17 : vector<16x128xf32>
    %c0_19 = arith.constant 0 : index
    %c0_20 = arith.constant 0 : index
    %19 = vector.load %arg3[%c0_19, %c0_20] : memref<1x128xf32, #tpu.memory_space<vmem>>, vector<1x128xf32>
    %20 = vector.broadcast %19 : vector<1x128xf32> to vector<16x128xf32>
    %21 = arith.addf %18, %20 : vector<16x128xf32>
    %cst_21 = arith.constant 0.000000e+00 : f32
    %22 = vector.broadcast %cst_21 : f32 to vector<16x128xf32>
    %23 = arith.maximumf %21, %22 : vector<16x128xf32>
    %c0_22 = arith.constant 0 : index
    %c0_23 = arith.constant 0 : index
    %c0_24 = arith.constant 0 : index
    %24 = vector.load %arg4[%c0_22, %c0_23, %c0_24] : memref<3x128x128xf32, #tpu.memory_space<vmem>>, vector<1x128x128xf32>
    %25 = vector.shape_cast %24 : vector<1x128x128xf32> to vector<128x128xf32>
    %cst_25 = arith.constant dense<0.000000e+00> : vector<16x128xf32>
    %26 = tpu.matmul %23, %25, %cst_25 {dimension_numbers = #tpu.dot_dimension_numbers<[1], [0], [0], [1], [0, 0, 1, 1], [], []>} : vector<16x128xf32>, vector<128x128xf32>, vector<16x128xf32> -> vector<16x128xf32>
    %c1_26 = arith.constant 1 : index
    %c0_27 = arith.constant 0 : index
    %c0_28 = arith.constant 0 : index
    %27 = vector.load %arg4[%c1_26, %c0_27, %c0_28] : memref<3x128x128xf32, #tpu.memory_space<vmem>>, vector<1x128x128xf32>
    %28 = vector.shape_cast %27 : vector<1x128x128xf32> to vector<128x128xf32>
    %cst_29 = arith.constant dense<0.000000e+00> : vector<16x128xf32>
    %29 = tpu.matmul %23, %28, %cst_29 {dimension_numbers = #tpu.dot_dimension_numbers<[1], [0], [0], [1], [0, 0, 1, 1], [], []>} : vector<16x128xf32>, vector<128x128xf32>, vector<16x128xf32> -> vector<16x128xf32>
    %c2_30 = arith.constant 2 : index
    %c0_31 = arith.constant 0 : index
    %c0_32 = arith.constant 0 : index
    %30 = vector.load %arg4[%c2_30, %c0_31, %c0_32] : memref<3x128x128xf32, #tpu.memory_space<vmem>>, vector<1x128x128xf32>
    %31 = vector.shape_cast %30 : vector<1x128x128xf32> to vector<128x128xf32>
    %cst_33 = arith.constant dense<0.000000e+00> : vector<16x128xf32>
    %32 = tpu.matmul %23, %31, %cst_33 {dimension_numbers = #tpu.dot_dimension_numbers<[1], [0], [0], [1], [0, 0, 1, 1], [], []>} : vector<16x128xf32>, vector<128x128xf32>, vector<16x128xf32> -> vector<16x128xf32>
    %cst_34 = arith.constant dense<0.000000e+00> : vector<16x128xf32>
    %33 = tpu.matmul %3, %26, %cst_34 {dimension_numbers = #tpu.dot_dimension_numbers<[1], [0], [0], [1], [0, 0, 1, 1], [], []>} : vector<16x16xf32>, vector<16x128xf32>, vector<16x128xf32> -> vector<16x128xf32>
    %34 = arith.addf %33, %29 : vector<16x128xf32>
    %cst_35 = arith.constant dense<0.000000e+00> : vector<16x128xf32>
    %35 = tpu.matmul %5, %32, %cst_35 {dimension_numbers = #tpu.dot_dimension_numbers<[1], [0], [0], [1], [0, 0, 1, 1], [], []>} : vector<16x16xf32>, vector<16x128xf32>, vector<16x128xf32> -> vector<16x128xf32>
    %36 = arith.addf %34, %35 : vector<16x128xf32>
    %c0_36 = arith.constant 0 : index
    %c0_37 = arith.constant 0 : index
    %37 = vector.load %arg5[%c0_36, %c0_37] : memref<1x128xf32, #tpu.memory_space<vmem>>, vector<1x128xf32>
    %38 = vector.broadcast %37 : vector<1x128xf32> to vector<16x128xf32>
    %39 = arith.addf %36, %38 : vector<16x128xf32>
    %cst_38 = arith.constant 0.000000e+00 : f32
    %40 = vector.broadcast %cst_38 : f32 to vector<16x128xf32>
    %41 = arith.maximumf %39, %40 : vector<16x128xf32>
    %c0_39 = arith.constant 0 : index
    %c0_40 = arith.constant 0 : index
    %c0_41 = arith.constant 0 : index
    %42 = vector.load %arg9[%c0_39, %c0_40, %c0_41] : memref<1x16x128xf32, #tpu.memory_space<vmem>>, vector<1x16x128xf32>
    %43 = vector.shape_cast %42 : vector<1x16x128xf32> to vector<16x128xf32>
    %44 = vector.shape_cast %41 : vector<16x128xf32> to vector<1x16x128xf32>
    tpu.vector_store %arg9[%c0_39, %c0_40, %c0_41], %44 {strides = array<i32>} : memref<1x16x128xf32, #tpu.memory_space<vmem>>, vector<1x16x128xf32>,
    %c0_42 = arith.constant 0 : index
    %c0_43 = arith.constant 0 : index
    %c0_44 = arith.constant 0 : index
    %45 = vector.load %arg7[%c0_42, %c0_43, %c0_44] : memref<2x8x16xf32, #tpu.memory_space<vmem>>, vector<1x8x16xf32>
    %46 = vector.shape_cast %45 : vector<1x8x16xf32> to vector<8x16xf32>
    %cst_45 = arith.constant dense<0.000000e+00> : vector<8x128xf32>
    %47 = tpu.matmul %46, %41, %cst_45 {dimension_numbers = #tpu.dot_dimension_numbers<[1], [0], [0], [1], [0, 0, 1, 1], [], []>} : vector<8x16xf32>, vector<16x128xf32>, vector<8x128xf32> -> vector<8x128xf32>
    %c1_46 = arith.constant 1 : index
    %c0_47 = arith.constant 0 : index
    %c0_48 = arith.constant 0 : index
    %48 = vector.load %arg7[%c1_46, %c0_47, %c0_48] : memref<2x8x16xf32, #tpu.memory_space<vmem>>, vector<1x8x16xf32>
    %49 = vector.shape_cast %48 : vector<1x8x16xf32> to vector<8x16xf32>
    %cst_49 = arith.constant dense<0.000000e+00> : vector<8x128xf32>
    %50 = tpu.matmul %49, %41, %cst_49 {dimension_numbers = #tpu.dot_dimension_numbers<[1], [0], [0], [1], [0, 0, 1, 1], [], []>} : vector<8x16xf32>, vector<16x128xf32>, vector<8x128xf32> -> vector<8x128xf32>
    %51 = arith.maximumf %47, %50 : vector<8x128xf32>
    %c0_50 = arith.constant 0 : index
    %c0_51 = arith.constant 0 : index
    %c0_52 = arith.constant 0 : index
    %52 = vector.load %arg8[%c0_50, %c0_51, %c0_52] : memref<2x128x64xf32, #tpu.memory_space<vmem>>, vector<1x128x64xf32>
    %53 = vector.shape_cast %52 : vector<1x128x64xf32> to vector<128x64xf32>
    %cst_53 = arith.constant dense<0.000000e+00> : vector<8x64xf32>
    %54 = tpu.matmul %51, %53, %cst_53 {dimension_numbers = #tpu.dot_dimension_numbers<[1], [0], [0], [1], [0, 0, 1, 1], [], []>} : vector<8x128xf32>, vector<128x64xf32>, vector<8x64xf32> -> vector<8x64xf32>
    %c1_54 = arith.constant 1 : index
    %c0_55 = arith.constant 0 : index
    %c0_56 = arith.constant 0 : index
    %55 = vector.load %arg8[%c1_54, %c0_55, %c0_56] : memref<2x128x64xf32, #tpu.memory_space<vmem>>, vector<1x128x64xf32>
    %56 = vector.shape_cast %55 : vector<1x128x64xf32> to vector<128x64xf32>
    %cst_57 = arith.constant dense<0.000000e+00> : vector<8x64xf32>
    %57 = tpu.matmul %51, %56, %cst_57 {dimension_numbers = #tpu.dot_dimension_numbers<[1], [0], [0], [1], [0, 0, 1, 1], [], []>} : vector<8x128xf32>, vector<128x64xf32>, vector<8x64xf32> -> vector<8x64xf32>
    %58 = arith.maximumf %54, %57 : vector<8x64xf32>
    %c0_58 = arith.constant 0 : index
    %c0_59 = arith.constant 0 : index
    %c0_60 = arith.constant 0 : index
    %59 = vector.load %arg10[%c0_58, %c0_59, %c0_60] : memref<1x8x64xf32, #tpu.memory_space<vmem>>, vector<1x8x64xf32>
    %60 = vector.shape_cast %59 : vector<1x8x64xf32> to vector<8x64xf32>
    %61 = vector.shape_cast %58 : vector<8x64xf32> to vector<1x8x64xf32>
    tpu.vector_store %arg10[%c0_58, %c0_59, %c0_60], %61 {strides = array<i32>} : memref<1x8x64xf32, #tpu.memory_space<vmem>>, vector<1x8x64xf32>,
    return
  }
  func.func @transform_0(%arg0: i32) -> (i32, i32, i32) {
    %c0_i32 = arith.constant 0 : i32
    %c0_i32_0 = arith.constant 0 : i32
    %c0_i32_1 = arith.constant 0 : i32
    return %arg0, %c0_i32, %c0_i32_0 : i32, i32, i32
  }
  func.func @transform_1(%arg0: i32) -> (i32, i32, i32) {
    %c0_i32 = arith.constant 0 : i32
    %c0_i32_0 = arith.constant 0 : i32
    %c0_i32_1 = arith.constant 0 : i32
    %c0_i32_2 = arith.constant 0 : i32
    return %c0_i32, %c0_i32_0, %c0_i32_1 : i32, i32, i32
  }
  func.func @transform_2(%arg0: i32) -> (i32, i32) {
    %c0_i32 = arith.constant 0 : i32
    %c0_i32_0 = arith.constant 0 : i32
    %c0_i32_1 = arith.constant 0 : i32
    return %c0_i32, %c0_i32_0 : i32, i32
  }
  func.func @transform_3(%arg0: i32) -> (i32, i32, i32) {
    %c0_i32 = arith.constant 0 : i32
    %c0_i32_0 = arith.constant 0 : i32
    %c0_i32_1 = arith.constant 0 : i32
    %c0_i32_2 = arith.constant 0 : i32
    return %c0_i32, %c0_i32_0, %c0_i32_1 : i32, i32, i32
  }
  func.func @transform_4(%arg0: i32) -> (i32, i32) {
    %c0_i32 = arith.constant 0 : i32
    %c0_i32_0 = arith.constant 0 : i32
    %c0_i32_1 = arith.constant 0 : i32
    return %c0_i32, %c0_i32_0 : i32, i32
  }
  func.func @transform_5(%arg0: i32) -> (i32, i32, i32) {
    %c0_i32 = arith.constant 0 : i32
    %c0_i32_0 = arith.constant 0 : i32
    %c0_i32_1 = arith.constant 0 : i32
    %c0_i32_2 = arith.constant 0 : i32
    return %c0_i32, %c0_i32_0, %c0_i32_1 : i32, i32, i32
  }
  func.func @transform_6(%arg0: i32) -> (i32, i32, i32) {
    %c0_i32 = arith.constant 0 : i32
    %c0_i32_0 = arith.constant 0 : i32
    %c0_i32_1 = arith.constant 0 : i32
    %c0_i32_2 = arith.constant 0 : i32
    return %c0_i32, %c0_i32_0, %c0_i32_1 : i32, i32, i32
  }
  func.func @transform_7(%arg0: i32) -> (i32, i32, i32) {
    %c0_i32 = arith.constant 0 : i32
    %c0_i32_0 = arith.constant 0 : i32
    %c0_i32_1 = arith.constant 0 : i32
    %c0_i32_2 = arith.constant 0 : i32
    return %c0_i32, %c0_i32_0, %c0_i32_1 : i32, i32, i32
  }
  func.func @transform_8(%arg0: i32) -> (i32, i32, i32) {
    %c0_i32 = arith.constant 0 : i32
    %c0_i32_0 = arith.constant 0 : i32
    %c0_i32_1 = arith.constant 0 : i32
    return %arg0, %c0_i32, %c0_i32_0 : i32, i32, i32
  }
  func.func @transform_9(%arg0: i32) -> (i32, i32, i32) {
    %c0_i32 = arith.constant 0 : i32
    %c0_i32_0 = arith.constant 0 : i32
    %c0_i32_1 = arith.constant 0 : i32
    return %arg0, %c0_i32, %c0_i32_0 : i32, i32, i32
  }
}

</mosaic_0001>

<bundles_post_ra>
// kernel: tpu_custom_call.1
= control target key start
LH: loop header
LB: loop body
LE: loop exit
PB: predicated region body
PF: predicated region fallthrough
CT: control target
= control target key end

     0   :  { %s3221_s0 = inlined_call_operand.hbm [shape: f32[2,16,64], index: 0, kind: input, shape index: {}]   ;;  %s3222_s1 = inlined_call_operand.hbm [shape: f32[3,64,128], index: 1, kind: input, shape index: {}]   ;;  %s3223_s2 = inlined_call_operand.vmem [shape: f32[1,128], index: 2, kind: input, shape index: {}]   ;;  %s3224_s3 = inlined_call_operand.vmem [shape: f32[3,128,128], index: 3, kind: input, shape index: {}]   ;;  %s3225_s4 = inlined_call_operand.vmem [shape: f32[1,128], index: 4, kind: input, shape index: {}]   ;;  %s3226_s5 = inlined_call_operand.hbm [shape: f32[2,16,16], index: 5, kind: input, shape index: {}]   ;;  %s3227_s6 = inlined_call_operand.hbm [shape: f32[2,8,16], index: 6, kind: input, shape index: {}]   ;;  %s3228_s7 = inlined_call_operand.vmem [shape: f32[2,128,64], index: 7, kind: input, shape index: {}]   ;;  %s3229_s8 = inlined_call_operand.hbm [shape: f32[2,16,128], index: 8, kind: output, shape index: {0}]   ;;  %s3230_s9 = inlined_call_operand.hbm [shape: f32[2,8,64], index: 9, kind: output, shape index: {1}]  }
   0x1   :  { %3237 = sst [smem:[#allocation18_spill]] %s3222_s1 }
   0x2   :  { %3238 = sst [smem:[#allocation19_spill]] %s3226_s5 }
   0x3   :  { %3239 = sst [smem:[#allocation20_spill]] %s3227_s6 }
   0x4   :  { %15 = vsyncpa [#allocation3], 0 }
   0x5   :  { %17 = vsyncpa [#allocation3 + $0x1], 0 }
   0x6   :  { %18 = vsyncpa [#allocation6], 0 }
   0x7   :  { %19 = vsyncpa [#allocation9], 0 }
   0x8   :  { %20 = vsyncpa [#allocation4], 0 }
   0x9   :  { %22 = vsyncpa [#allocation4 + $0x1], 0 }
   0xa   :  { %23 = vsyncpa [#allocation12], 0 }
   0xb   :  { %25 = vsyncpa [#allocation12 + $0x1], 0  ;;  %s2643_s30 = smov 0   ;;  %s2645_s10 = smov 0  }
   0xc   :  { %s2647_s11 = smov 0   ;;  %s2649_s12 = smov 0  }
   0xd LB: > { %s2664_s13 = sadd.s32 4294967295, %s2579_s12   ;;  %s1778_s14 = sadd.s32 4294967294, %s2579_s12   ;;  %s2579_s12 = sphi %s2649_s12, %s3263_s12   ;;  %s2575_s11 = sphi %s2647_s11, %s3262_s11   ;;  %s2571_s10 = sphi %s2645_s10, %s3261_s10   ;;  %s2567_s30 = sphi %s2643_s30, %s3260_s30  }
   0xe   : > { %p51_p0 = scmp.ne.s32.totalorder %s2571_s10, %s2567_s30  ;;  %p3231_p1 = scmp.eq.s32.totalorder %s2664_s13, 0 }
   0xf   : > { %p222_p2 = scmp.eq.s32.totalorder %s2664_s13, 1  ;;  %p228_p3 = scmp.eq.s32.totalorder %s1778_s14, 1 }
  0x10   : > { %p2673_p4 = por %p3231_p1, %p51_p0  ;;  %p1779_p5 = scmp.ge.s32.totalorder %s2579_s12, 1 }
  0x11   : > { %p2678_p6 = por %p228_p3, %p51_p0  ;;  %p261_p7 = scmp.lt.s32.totalorder %s2579_s12, 3 }
  0x12   : > { %s3240_s15 = scalar_select %p2673_p4, 1, 0 }
  0x13   : > { %s3241_s16 = scalar_select %p2678_p6, 1, 0 }
  0x14   : > { %p2683_p8 = pnand %p1779_p5, %p261_p7  ;;  %s2581_s18 = smov [#allocation5]  }
  0x15   : > { %s273_s19 = sshll.u32 %s2581_s18, 4  ;;  %s2582_s21 = smov [#allocation7]   ;;  %s274_s19 = int_to_ptr.vmem [resolvable:$true] %s273_s19 }
  0x16   : > { %s3242_s17 = scalar_select %p2683_p8, 1, 0 }
  0x17   : > { %p2301_p9 = pneg %p2683_p8  ;;  %s295_s22 = sshll.u32 %s2582_s21, 4  ;;  %s296_s22 = int_to_ptr.vmem [resolvable:$true] %s295_s22 }
  0x18   : > { %s2583_s23 = smov [#allocation8]   ;;  %s2382_s25 = scalar_lea.vmem %s274_s19, 3072 }
  0x19   : > { %p2692_p11 = pnand %p2301_p9, %p3231_p1  ;;  %s308_s24 = sshll.u32 %s2583_s23, 4  ;;  %s309_s24 = int_to_ptr.vmem [resolvable:$true] %s308_s24 }
  0x1a   : > { %p2383_p13 = scmp.ne.s32.totalorder %s274_s19, %s2382_s25  ;;  %p2390_p5 = scmp.lt.s32.totalorder %s274_s19, %s274_s19 }
  0x1b   : > { %p2373_p12 = pneg %p2692_p11  ;;  %p2391_p7 = scmp.lt.s32.totalorder %s2382_s25, %s2382_s25 }
  0x1d   : > { %p2385_p0 = pnand %p2383_p13, %p2373_p12  ;;  %p2392_p9 = por %p2391_p7, %p2390_p5 }
  0x1f   : > { %p2386_p3 = pneg %p2385_p0 }
  0x21   : > { %p2393_p10 = pnand %p2392_p9, %p2386_p3 }
  0x23   : > { %2396 = shalt.err (!%p2393_p10)
}
  0x24   : > { %s3232_s26 = smov 128   ;;  %s3233_s27 = smov 8  }
  0x25   : > { %s3244_s1 = sld [smem:[#allocation18_spill]]  ;;  %s2408_s14 = scalar_lea.vmem %s296_s22, 512 }
  0x26   : > { %p2409_p13 = scmp.ne.s32.totalorder %s296_s22, %s2408_s14  ;;  %p2416_p3 = scmp.lt.s32.totalorder %s296_s22, %s296_s22 }
  0x27   : > { %p2417_p10 = scmp.lt.s32.totalorder %s2408_s14, %s2408_s14 }
  0x28   : > { %p2411_p0 = pnand %p2409_p13, %p2373_p12 }
  0x29   : > { %p2418_p7 = por %p2417_p10, %p2416_p3 }
  0x2a   : > { %p2412_p5 = pneg %p2411_p0 }
  0x2b   : > { %2304 = dma.hbm_to_vmem [thread:$0]  (!%p2692_p11), %s3244_s1, 3072, %s274_s19, [#allocation6], %s3232_s26, %s3232_s26, %s3233_s27  }
  0x2c   : > { %p2419_p9 = pnand %p2418_p7, %p2412_p5 }
  0x2e   : > { %2422 = shalt.err (!%p2419_p9)
}
  0x2f   : > { %s3245_s5 = sld [smem:[#allocation19_spill]]  ;;  %s2434_s19 = scalar_lea.vmem %s309_s24, 256 }
  0x30   : > { %p2435_p1 = scmp.ne.s32.totalorder %s309_s24, %s2434_s19  ;;  %p2442_p3 = scmp.lt.s32.totalorder %s309_s24, %s309_s24 }
  0x31   : > { %p2443_p5 = scmp.lt.s32.totalorder %s2434_s19, %s2434_s19 }
  0x32   : > { %p2437_p13 = pnand %p2435_p1, %p2373_p12 }
  0x33   : > { %p2444_p10 = por %p2443_p5, %p2442_p3 }
  0x34   : > { %p2438_p0 = pneg %p2437_p13 }
  0x35   : > { %2307 = dma.hbm_to_vmem [thread:$0]  (!%p2692_p11), %s3245_s5, 512, %s296_s22, [#allocation6], %s3232_s26, %s3232_s26, %s3233_s27  }
  0x36   : > { %p2445_p7 = pnand %p2444_p10, %p2438_p0 }
  0x38   : > { %2448 = shalt.err (!%p2445_p7)
}
  0x39   : > { %s3246_s6 = sld [smem:[#allocation20_spill]]  ;;  %s2732_s22 = sadd.s32 1, %s2579_s12  }
  0x3a   : > { %s35_s20 = ssub.s32 %s2579_s12, %s2732_s22  ;;  %s38_s28 = sadd.s32 1, %s2575_s11 }
  0x3b   : > { %p36_p1 = scmp.eq.s32.totalorder %s35_s20, 0  ;;  %p45_p12 = scmp.ne.s32.totalorder %s2575_s11, %s2571_s10 }
  0x3c   : > { %p46_p9 = scmp.eq.s32.totalorder %s2579_s12, 0  ;;  %p2325_p13 = scmp.lt.s32.totalorder %s2579_s12, 2 }
  0x3d   : > { %s2742_s29 = scalar_select %p36_p1, %s2575_s11, %s38_s28  }
  0x3e   : > { %p47_p0 = por %p46_p9, %p45_p12  ;;  %p2746_p3 = por %p222_p2, %p45_p12 }
  0x3f   : > { %2310 = dma.hbm_to_vmem [thread:$0]  (!%p2692_p11), %s3246_s6, 256, %s309_s24, [#allocation9], %s3232_s26, %s3232_s26, %s3233_s27  }
  0x40   : > { %s3247_s14 = scalar_select %p2746_p3, 1, 0 }
  0x41   : > { %s325_s18 = sand.u32 1, %s2575_s11   ;;  %s1867_s21 = sshll.u32 %s2579_s12, 8 }
  0x42   : > { %s1784_s24 = sshll.u32 %s325_s18, 4  ;;  %s2755_s25 = scalar_lea.hbm %s3221_s0, %s1867_s21 }
  0x43   : > { %s329_s20 = scalar_lea.vmem [#allocation2], %s1784_s24  ;;  %p2757_p11 = pnand %p2325_p13, %p47_p0 }
  0x44   : > { %s336_s28 = sshll.u32 %s329_s20, 4  ;;  %s2763_s27 = scalar_lea.sflag [#allocation3], %s325_s18  ;;  %s2761_s28 = int_to_ptr.vmem [resolvable:$true] %s336_s28 }
  0x45   : > { %s2449_s1 = scalar_lea.hbm %s2755_s25, 256  ;;  %p2451_p5 = pneg %p2757_p11 }
  0x46   : > { %p2450_p2 = scmp.ne.s32.totalorder %s2755_s25, %s2449_s1  ;;  %s2454_s24 = scalar_lea.hbm %s3221_s0, 512 }
  0x47   : > { %p2455_p1 = scmp.lt.s32.totalorder %s2755_s25, %s3221_s0  ;;  %p2456_p12 = scmp.lt.s32.totalorder %s2454_s24, %s2449_s1 }
  0x48   : > { %p2452_p10 = pnand %p2451_p5, %p2450_p2 }
  0x49   : > { %p2457_p9 = por %p2456_p12, %p2455_p1 }
  0x4a   : > { %p2453_p7 = pneg %p2452_p10 }
  0x4c   : > { %p2458_p13 = pnand %p2457_p9, %p2453_p7 }
  0x4e   : > { %2461 = shalt.err (!%p2458_p13)
}
  0x4f   : > { %s2462_s18 = scalar_lea.vmem %s2761_s28, 256  ;;  %s2586_s5 = smov [#allocation2]  }
  0x50   : > { %p2463_p0 = scmp.ne.s32.totalorder %s2761_s28, %s2462_s18  ;;  %s2467_s6 = sshll.u32 %s2586_s5, 4  ;;  %s2468_s6 = int_to_ptr.vmem [resolvable:$false] %s2467_s6 }
  0x51   : > { %s2469_s21 = scalar_lea.vmem %s2468_s6, 512  ;;  %p2470_p10 = scmp.lt.s32.totalorder %s2761_s28, %s2468_s6 }
  0x52   : > { %p2465_p6 = pnand %p2463_p0, %p2451_p5  ;;  %p2471_p3 = scmp.lt.s32.totalorder %s2469_s21, %s2462_s18 }
  0x54   : > { %p2466_p2 = pneg %p2465_p6  ;;  %p2472_p4 = por %p2471_p3, %p2470_p10 }
  0x56   : > { %p2473_p8 = pnand %p2472_p4, %p2466_p2 }
  0x58   : > { %2476 = shalt.err (!%p2473_p8)
}
  0x59   : > { %s3249_s1 = smov 8   ;;  %s3250_s19 = smov 128  }
  0x5a   : > { %2314 = dma.hbm_to_vmem [thread:$0]  (!%p2757_p11), %s2755_s25, 256, %s2761_s28, %s2763_s27, %s3250_s19, %s3250_s19, %s3249_s1  }
  0x5b   : > { %p3251_p6 = scmp.ne.s32.totalorder %s3242_s17, 0 }
  0x5c   : > { %s2790_s5 = sand.u32 (!%p3251_p6), 1, %s2571_s10   ;;  %p3252_p4 = scmp.ne.s32.totalorder (!%p3251_p6), %s3240_s15, 0 }
  0x5d   : > { %348 = sbr.rel (%p3251_p6) target bundleno = 1376 (0x560), region = 52  ;;  %s1788_s6 = sshll.u32 (!%p3251_p6), %s2790_s5, 4 }
  0x5e   : > { %s351_s24 = scalar_lea.sflag (!%p3251_p6), [#allocation3], %s2790_s5  ;;  %s2796_s26 = scalar_lea.vmem (!%p3251_p6), [#allocation2], %s1788_s6 }
  0x62   : > { %2546 = dma.done.wait (%p3252_p4), %s351_s24, 256  }
  0x63   : > { %2548 = vsyncadd (%p3252_p4), %s351_s24, 4294967040  ;;  %p3253_p8 = scmp.eq.s32.totalorder %s2664_s13, 0 }
  0x65   : > { %2550 = dma.done.wait (%p3253_p8), [#allocation6], 3584   ;;  %p3254_p3 = pmov %p3253_p8 }
  0x67   : > { %2552 = vsyncadd (%p3254_p3), [#allocation6], 4294963712  ;;  %p3255_p11 = pmov %p3254_p3 }
  0x68   : > { %p3256_p5 = pmov %p3254_p3 }
  0x69   : > { %2554 = dma.done.wait (%p3255_p11), [#allocation9], 256  }
  0x6a   : > { %2556 = vsyncadd (%p3256_p5), [#allocation9], 4294967040  ;;  %v420_v0 = vld [vmem:[#allocation5 + $0x38] sm:$0xff]  ;;  %v419_v1 = vld [vmem:[#allocation5 + $0x30] sm:$0xff]  ;;  %vm421_vm0 = vcmask 523264   ;;  %vm671_vm1 = vcmask 130048  }
  0x6b   : > { %2009 = vmatprep.subr.mxu0 %v420_v0  ;;  %v418_v2 = vld [vmem:[#allocation5 + $0x28] sm:$0xff]  ;;  %v406_v3 = vld [vmem:[%s2796_s26] sm:$0xff]  ;;  %v416_v5 = vld [vmem:[#allocation5 + $0x18] sm:$0xff]  ;;  %vm2588_vm2 = vmmov 0   ;;  %s3048_s18 = scalar_lea.vmem [#allocation10], %s1788_s6  ;;  %s1868_s1 = sshll.u32 %s2664_s13, 8 }
  0x6c   : > { %2010 = vmatpush3.msra.mxu0 %v420_v0  ;;  %2025 = vmatprep.mubr.msk.f32.mxu0 %vm421_vm0, %v406_v3  ;;  %v417_v4 = vld [vmem:[#allocation5 + $0x20] sm:$0xff]  ;;  %v511_v6 = vld [vmem:[#allocation5 + $0x78] sm:$0xff]  ;;  %v415_v7 = vld [vmem:[#allocation5 + $0x10] sm:$0xff]  ;;  %s1631_s21 = sshll.u32 %s3048_s18, 4  ;;  %s1613_s15 = scalar_lea.sflag [#allocation4], %s2790_s5  ;;  %s3141_s21 = int_to_ptr.vmem [resolvable:$true] %s1631_s21 }
  0x6d   : > { %2011 = vmatprep.subr.mxu0 %v419_v1  ;;  %2044 = vmatprep.mubr.msk.f32.mxu1 %vm421_vm0, %v406_v3  ;;  %v414_v8 = vld [vmem:[#allocation5 + $0x8] sm:$0xff]  ;;  %v413_v9 = vld [vmem:[#allocation5] sm:$0xff]  ;;  %v595_v11 = vld [vmem:[#allocation5 + $0xb8] sm:$0xff]  ;;  %s2477_s17 = scalar_lea.vmem %s3141_s21, 256  ;;  %p3257_p1 = scmp.ne.s32.totalorder %s3247_s14, 0 }
  0x6e   : > { %2012 = vmatpush3.msra.mxu0 %v419_v1  ;;  %2028 = vmatprep.subr.mxu1 %v511_v6  ;;  %v407_v10 = vld [vmem:[%s2796_s26 + $0x8] sm:$0xff]  ;;  %v594_v12 = vld [vmem:[#allocation5 + $0xb0] sm:$0xff]  ;;  %v592_v14 = vld [vmem:[#allocation5 + $0xa0] sm:$0xff]  ;;  %s3147_s26 = scalar_lea.hbm %s3229_s8, %s1868_s1  ;;  %p2478_p7 = scmp.ne.s32.totalorder %s3141_s21, %s2477_s17 }
  0x6f   : > { %2013 = vmatprep.subr.mxu0 %v418_v2  ;;  %2029 = vmatpush3.msra.mxu1 %v511_v6  ;;  %v593_v13 = vld [vmem:[#allocation5 + $0xa8] sm:$0xff]  ;;  %v591_v15 = vld [vmem:[#allocation5 + $0x98] sm:$0xff]  ;;  %v590_v16 = vld [vmem:[#allocation5 + $0x90] sm:$0xff]  ;;  %s2589_s27 = smov [#allocation10]  }
  0x70   : > { %2014 = vmatpush3.msra.mxu0 %v418_v2  ;;  %v589_v17 = vld [vmem:[#allocation5 + $0x88] sm:$0xff]  ;;  %v588_v18 = vld [vmem:[#allocation5 + $0x80] sm:$0xff]  ;;  %v510_v19 = vld [vmem:[#allocation5 + $0x70] sm:$0xff]  ;;  %p2479_p12 = pnand %p2478_p7, %p3257_p1  ;;  %s2481_s25 = sshll.u32 %s2589_s27, 4  ;;  %s2482_s25 = int_to_ptr.vmem [resolvable:$false] %s2481_s25 }
  0x71   : > { %2015 = vmatprep.subr.mxu0 %v417_v4  ;;  %2030 = vmatprep.subr.mxu1 %v510_v19  ;;  %v509_v20 = vld [vmem:[#allocation5 + $0x68] sm:$0xff]  ;;  %v508_v21 = vld [vmem:[#allocation5 + $0x60] sm:$0xff]  ;;  %v507_v22 = vld [vmem:[#allocation5 + $0x58] sm:$0xff]  ;;  %p2484_p13 = scmp.lt.s32.totalorder %s3141_s21, %s2482_s25 }
  0x72   : > { %2016 = vmatpush3.msra.mxu0 %v417_v4  ;;  %2031 = vmatpush3.msra.mxu1 %v510_v19  ;;  %v2817_v23 = vld [vmem:[#allocation7] sm:$0xff]  ;;  %v506_v24 = vld [vmem:[#allocation5 + $0x50] sm:$0xff]  ;;  %v505_v25 = vld [vmem:[#allocation5 + $0x48] sm:$0xff]  ;;  %p2480_p9 = pneg %p2479_p12 }
  0x73   : > { %2017 = vmatprep.subr.mxu0 %v416_v5  ;;  %2032 = vmatprep.subr.mxu1 %v509_v20  ;;  %v504_v26 = vld [vmem:[#allocation5 + $0x40] sm:$0xff]  ;;  %v2822_v27 = vld [vmem:[#allocation7 + $0x10] sm:$0xff]  ;;  %v2826_v30 = vld [vmem:[#allocation7 + $0x8] sm:$0xff] }
  0x74   : > { %2018 = vmatpush3.msra.mxu0 %v416_v5  ;;  %2033 = vmatpush3.msra.mxu1 %v509_v20  ;;  %v1820_v31 = vld [vmem:[%s3224_s3 + $0xf8] sm:$0xff]  ;;  %v1819_v32 = vld [vmem:[%s3224_s3 + $0xf0] sm:$0xff]  ;;  %v1818_v33 = vld [vmem:[%s3224_s3 + $0xe8] sm:$0xff] }
  0x75   : > { %2019 = vmatprep.subr.mxu0 %v415_v7  ;;  %2034 = vmatprep.subr.mxu1 %v508_v21  ;;  %v1817_v34 = vld [vmem:[%s3224_s3 + $0xe0] sm:$0xff]  ;;  %v1816_v35 = vld [vmem:[%s3224_s3 + $0xd8] sm:$0xff]  ;;  %v1815_v36 = vld [vmem:[%s3224_s3 + $0xd0] sm:$0xff] }
  0x76   : > { %2020 = vmatpush3.msra.mxu0 %v415_v7  ;;  %2035 = vmatpush3.msra.mxu1 %v508_v21  ;;  %v1814_v37 = vld [vmem:[%s3224_s3 + $0xc8] sm:$0xff]  ;;  %v1813_v39 = vld [vmem:[%s3224_s3 + $0xc0] sm:$0xff]  ;;  %v2854_v41 = vld [vmem:[#allocation7 + $0x18] sm:$0xff] }
  0x77   : > { %2021 = vmatprep.subr.mxu0 %v414_v8  ;;  %2036 = vmatprep.subr.mxu1 %v507_v22  ;;  %v862_v42 = vld [vmem:[%s3224_s3 + $0x78] sm:$0xff]  ;;  %v861_v43 = vld [vmem:[%s3224_s3 + $0x70] sm:$0xff]  ;;  %v860_v44 = vld [vmem:[%s3224_s3 + $0x68] sm:$0xff] }
  0x78   : > { %2022 = vmatpush3.msra.mxu0 %v414_v8  ;;  %2037 = vmatpush3.msra.mxu1 %v507_v22  ;;  %v859_v45 = vld [vmem:[%s3224_s3 + $0x60] sm:$0xff]  ;;  %v858_v46 = vld [vmem:[%s3224_s3 + $0x58] sm:$0xff]  ;;  %v857_v47 = vld [vmem:[%s3224_s3 + $0x50] sm:$0xff] }
  0x79   : > { %2023 = vmatprep.subr.mxu0 %v413_v9  ;;  %2038 = vmatprep.subr.mxu1 %v506_v24  ;;  %v856_v48 = vld [vmem:[%s3224_s3 + $0x48] sm:$0xff]  ;;  %v855_v49 = vld [vmem:[%s3224_s3 + $0x40] sm:$0xff]  ;;  %v854_v50 = vld [vmem:[%s3224_s3 + $0x38] sm:$0xff] }
  0x7a   : > { %2024 = vmatpush3.msra.mxu0 %v413_v9  ;;  %2039 = vmatpush3.msra.mxu1 %v506_v24  ;;  %v1812_v51 = vld [vmem:[%s3224_s3 + $0xb8] sm:$0xff]  ;;  %v853_v52 = vld [vmem:[%s3224_s3 + $0x30] sm:$0xff]  ;;  %v852_v54 = vld [vmem:[%s3224_s3 + $0x28] sm:$0xff] }
  0x7b   : > { %2026 = vmatmul.mubr.msk.f32.vlgmr.msra.gmra.mxu0 %vm421_vm0, %v407_v10  ;;  %2047 = vmatprep.subr.mxu0 %v595_v11  ;;  %v1811_v53 = vld [vmem:[%s3224_s3 + $0xb0] sm:$0xff]  ;;  %v1810_v55 = vld [vmem:[%s3224_s3 + $0xa8] sm:$0xff]  ;;  %v851_v56 = vld [vmem:[%s3224_s3 + $0x20] sm:$0xff] }
  0x7c   : > { %2048 = vmatpush3.msra.mxu0 %v595_v11  ;;  %2063 = vmatprep.mubr.msk.f32.mxu0 %vm421_vm0, %v406_v3  ;;  %v1809_v57 = vld [vmem:[%s3224_s3 + $0xa0] sm:$0xff]  ;;  %v850_v58 = vld [vmem:[%s3224_s3 + $0x18] sm:$0xff]  ;;  %v849_v60 = vld [vmem:[%s3224_s3 + $0x10] sm:$0xff] }
  0x7d   : > { %2049 = vmatprep.subr.mxu0 %v594_v12  ;;  %2040 = vmatprep.subr.mxu1 %v505_v25  ;;  %v1808_v59 = vld [vmem:[%s3224_s3 + $0x98] sm:$0xff]  ;;  %v1807_v61 = vld [vmem:[%s3224_s3 + $0x90] sm:$0xff]  ;;  %v848_v62 = vld [vmem:[%s3224_s3 + $0x8] sm:$0xff] }
  0x7e   : > { %2050 = vmatpush3.msra.mxu0 %v594_v12  ;;  %2041 = vmatpush3.msra.mxu1 %v505_v25  ;;  %v1806_v63 = vld [vmem:[%s3224_s3 + $0x88] sm:$0xff]  ;;  %v847_v0 = vld [vmem:[%s3224_s3] sm:$0xff]  ;;  %v1836_v2 = vld [vmem:[%s3224_s3 + $0x178] sm:$0xff] }
  0x7f   : > { %2051 = vmatprep.subr.mxu0 %v593_v13  ;;  %2042 = vmatprep.subr.mxu1 %v504_v26  ;;  %v1805_v1 = vld [vmem:[%s3224_s3 + $0x80] sm:$0xff]  ;;  %v1834_v19 = vld [vmem:[%s3224_s3 + $0x168] sm:$0xff]  ;;  %v1832_v21 = vld [vmem:[%s3224_s3 + $0x158] sm:$0xff] }
  0x80   : > { %2052 = vmatpush3.msra.mxu0 %v593_v13  ;;  %2043 = vmatpush3.msra.mxu1 %v504_v26  ;;  %v1804_v11 = vld [vmem:[%s3223_s2] ss:$0 sm:$0xff]  ;;  %v1831_v22 = vld [vmem:[%s3224_s3 + $0x150] sm:$0xff]  ;;  %v1828_v25 = vld [vmem:[%s3224_s3 + $0x138] sm:$0xff] }
  0x81   : > { %2053 = vmatprep.subr.mxu0 %v592_v14  ;;  %2045 = vmatmul.mubr.msk.f32.vlgmr.msra.gmra.mxu1 %vm421_vm0, %v407_v10  ;;  %v1833_v20 = vld [vmem:[%s3224_s3 + $0x160] sm:$0xff]  ;;  %v1827_v26 = vld [vmem:[%s3224_s3 + $0x130] sm:$0xff] }
  0x82   : > { %2054 = vmatpush3.msra.mxu0 %v592_v14  ;;  %2077 = vmatprep.mubr.msk.f32.mxu1 %vm671_vm1, %v2822_v27  ;;  %v1829_v24 = vld [vmem:[%s3224_s3 + $0x140] sm:$0xff] }
  0x83   : > { %2055 = vmatprep.subr.mxu0 %v591_v15 }
  0x84   : > { %2056 = vmatpush3.msra.mxu0 %v591_v15 }
  0x85   : > { %2057 = vmatprep.subr.mxu0 %v590_v16 }
  0x86   : > { %2058 = vmatpush3.msra.mxu0 %v590_v16 }
  0x87   : > { %2059 = vmatprep.subr.mxu0 %v589_v17 }
  0x88   : > { %2060 = vmatpush3.msra.mxu0 %v589_v17 }
  0x89   : > { %2061 = vmatprep.subr.mxu0 %v588_v18 }
  0x8a   : > { %2062 = vmatpush3.msra.mxu0 %v588_v18  ;;  %v1835_v18 = vld [vmem:[%s3224_s3 + $0x170] sm:$0xff] }
  0x8b   : > { %2064 = vmatmul.mubr.msk.f32.vlgmr.msra.gmra.mxu0 %vm421_vm0, %v407_v10 }
  0x8c   : > { %2070 = vmatprep.mubr.msk.f32.mxu0 %vm671_vm1, %v2817_v23 }
 0x13b   : > { %v2027_v28 = vpop.f32.mrf.mxu0 }
 0x13c   : > { %2066 = vmatprep.subr.mxu0 %v2027_v28 }
 0x13d   : > { %v494_v29 = vpop.f32.mrf.mxu0  ;;  %2067 = vmatpush3.msra.mxu0 %v2027_v28  ;;  %v1826_v28 = vld [vmem:[%s3224_s3 + $0x128] sm:$0xff] }
 0x13e   : > { %2068 = vmatprep.subr.mxu0 %v494_v29 }
 0x13f   : > { %2069 = vmatpush3.msra.mxu0 %v494_v29  ;;  %v1825_v29 = vld [vmem:[%s3224_s3 + $0x120] sm:$0xff] }
 0x140   : > { %2071 = vmatmul.mubr.msk.f32.vlgmr.msra.gmra.mxu0 %vm671_vm1, %v2826_v30  ;;  %2115 = vmatprep.subr.mxu0 %v1820_v31 }
 0x141   : > { %2116 = vmatpush3.msra.mxu0 %v1820_v31  ;;  %v2046_v3 = vpop.f32.mrf.mxu1  ;;  %v1824_v31 = vld [vmem:[%s3224_s3 + $0x118] sm:$0xff] }
 0x142   : > { %2117 = vmatprep.subr.mxu0 %v1819_v32 }
 0x143   : > { %2118 = vmatpush3.msra.mxu0 %v1819_v32  ;;  %v578_v5 = vpop.f32.mrf.mxu1  ;;  %v1823_v32 = vld [vmem:[%s3224_s3 + $0x110] sm:$0xff] }
 0x144   : > { %2119 = vmatprep.subr.mxu0 %v1818_v33 }
 0x145   : > { %2120 = vmatpush3.msra.mxu0 %v1818_v33  ;;  %v1822_v33 = vld [vmem:[%s3224_s3 + $0x108] sm:$0xff] }
 0x146   : > { %2121 = vmatprep.subr.mxu0 %v1817_v34 }
 0x147   : > { %2122 = vmatpush3.msra.mxu0 %v1817_v34  ;;  %v1821_v34 = vld [vmem:[%s3224_s3 + $0x100] sm:$0xff] }
 0x148   : > { %2123 = vmatprep.subr.mxu0 %v1816_v35 }
 0x149   : > { %2124 = vmatpush3.msra.mxu0 %v1816_v35 }
 0x14a   : > { %2125 = vmatprep.subr.mxu0 %v1815_v36 }
 0x14b   : > { %v2065_v38 = vpop.f32.mrf.mxu0  ;;  %2126 = vmatpush3.msra.mxu0 %v1815_v36 }
 0x14c   : > { %2073 = vmatprep.subr.mxu1 %v2065_v38  ;;  %2127 = vmatprep.subr.mxu0 %v1814_v37 }
 0x14d   : > { %v662_v40 = vpop.f32.mrf.mxu0  ;;  %2074 = vmatpush3.msra.mxu1 %v2065_v38  ;;  %2128 = vmatpush3.msra.mxu0 %v1814_v37 }
 0x14e   : > { %2075 = vmatprep.subr.mxu1 %v662_v40  ;;  %2129 = vmatprep.subr.mxu0 %v1813_v39 }
 0x14f   : > { %2076 = vmatpush3.msra.mxu1 %v662_v40  ;;  %2130 = vmatpush3.msra.mxu0 %v1813_v39  ;;  %v2587_v39 = vmov 0.0   ;;  %v1857_v40 = vld [vmem:[%s3228_s7 + $0xe8] sm:$0xff] }
 0x150   : > { %2078 = vmatmul.mubr.msk.f32.vlgmr.msra.gmra.mxu1 %vm671_vm1, %v2854_v41  ;;  %2080 = vmatprep.subr.mxu1 %v862_v42 }
 0x151   : > { %2081 = vmatpush3.msra.mxu1 %v862_v42  ;;  %2131 = vmatprep.subr.mxu0 %v1812_v51  ;;  %v1855_v42 = vld [vmem:[%s3228_s7 + $0xd8] sm:$0xff] }
 0x152   : > { %2082 = vmatprep.subr.mxu1 %v861_v43  ;;  %2132 = vmatpush3.msra.mxu0 %v1812_v51 }
 0x153   : > { %2083 = vmatpush3.msra.mxu1 %v861_v43  ;;  %2133 = vmatprep.subr.mxu0 %v1811_v53  ;;  %v1854_v43 = vld [vmem:[%s3228_s7 + $0xd0] sm:$0xff] }
 0x154   : > { %2084 = vmatprep.subr.mxu1 %v860_v44  ;;  %2134 = vmatpush3.msra.mxu0 %v1811_v53 }
 0x155   : > { %2085 = vmatpush3.msra.mxu1 %v860_v44  ;;  %2135 = vmatprep.subr.mxu0 %v1810_v55  ;;  %v1853_v44 = vld [vmem:[%s3228_s7 + $0xc8] sm:$0xff] }
 0x156   : > { %2086 = vmatprep.subr.mxu1 %v859_v45  ;;  %2136 = vmatpush3.msra.mxu0 %v1810_v55 }
 0x157   : > { %2087 = vmatpush3.msra.mxu1 %v859_v45  ;;  %2137 = vmatprep.subr.mxu0 %v1809_v57  ;;  %v1852_v45 = vld [vmem:[%s3228_s7 + $0xc0] sm:$0xff] }
 0x158   : > { %2088 = vmatprep.subr.mxu1 %v858_v46  ;;  %2138 = vmatpush3.msra.mxu0 %v1809_v57 }
 0x159   : > { %2089 = vmatpush3.msra.mxu1 %v858_v46  ;;  %2139 = vmatprep.subr.mxu0 %v1808_v59  ;;  %v1851_v46 = vld [vmem:[%s3228_s7 + $0xb8] sm:$0xff] }
 0x15a   : > { %2090 = vmatprep.subr.mxu1 %v857_v47  ;;  %2140 = vmatpush3.msra.mxu0 %v1808_v59 }
 0x15b   : > { %2091 = vmatpush3.msra.mxu1 %v857_v47  ;;  %2141 = vmatprep.subr.mxu0 %v1807_v61  ;;  %v1850_v47 = vld [vmem:[%s3228_s7 + $0xb0] sm:$0xff] }
 0x15c   : > { %2092 = vmatprep.subr.mxu1 %v856_v48  ;;  %2142 = vmatpush3.msra.mxu0 %v1807_v61 }
 0x15d   : > { %2093 = vmatpush3.msra.mxu1 %v856_v48  ;;  %2143 = vmatprep.subr.mxu0 %v1806_v63  ;;  %v1849_v48 = vld [vmem:[%s3228_s7 + $0xa8] sm:$0xff] }
 0x15e   : > { %2094 = vmatprep.subr.mxu1 %v855_v49  ;;  %2144 = vmatpush3.msra.mxu0 %v1806_v63 }
 0x15f   : > { %2095 = vmatpush3.msra.mxu1 %v855_v49  ;;  %2145 = vmatprep.subr.mxu0 %v1805_v1  ;;  %v1848_v49 = vld [vmem:[%s3228_s7 + $0xa0] sm:$0xff] }
 0x160   : > { %2096 = vmatprep.subr.mxu1 %v854_v50  ;;  %2146 = vmatpush3.msra.mxu0 %v1805_v1  ;;  %v1287_v1 = vld [vmem:[#allocation8] sm:$0xff] }
 0x161   : > { %2097 = vmatpush3.msra.mxu1 %v854_v50 }
 0x162   : > { %2098 = vmatprep.subr.mxu1 %v853_v52 }
 0x163   : > { %2099 = vmatpush3.msra.mxu1 %v853_v52 }
 0x164   : > { %2100 = vmatprep.subr.mxu1 %v852_v54 }
 0x165   : > { %2101 = vmatpush3.msra.mxu1 %v852_v54 }
 0x166   : > { %2102 = vmatprep.subr.mxu1 %v851_v56 }
 0x167   : > { %2103 = vmatpush3.msra.mxu1 %v851_v56  ;;  %v1841_v56 = vld [vmem:[%s3225_s4] ss:$0 sm:$0xff] }
 0x168   : > { %2104 = vmatprep.subr.mxu1 %v850_v58 }
 0x169   : > { %2105 = vmatpush3.msra.mxu1 %v850_v58 }
 0x16a   : > { %2106 = vmatprep.subr.mxu1 %v849_v60 }
 0x16b   : > { %2107 = vmatpush3.msra.mxu1 %v849_v60 }
 0x16c   : > { %2108 = vmatprep.subr.mxu1 %v848_v62 }
 0x16d   : > { %2109 = vmatpush3.msra.mxu1 %v848_v62 }
 0x16e   : > { %2110 = vmatprep.subr.mxu1 %v847_v0 }
 0x16f   : > { %2111 = vmatpush3.msra.mxu1 %v847_v0 }
 0x170   : > { %2150 = vmatprep.subr.mxu1 %v1836_v2 }
 0x200   : > { %v2072_v4 = vpop.f32.mrf.mxu0 }
 0x201   : > { %v750_v7 = vadd.f32 %v2072_v4, %v2046_v3  ;;  %v1452_v3 = vld [vmem:[%s3228_s7 + $0x78] sm:$0xff]  ;;  %v1451_v4 = vld [vmem:[%s3228_s7 + $0x70] sm:$0xff] }
 0x202   : > { %v744_v6 = vpop.f32.mrf.mxu0 }
 0x203   : > { %v745_v9 = vadd.f32 %v744_v6, %v578_v5  ;;  %v1450_v5 = vld [vmem:[%s3228_s7 + $0x68] sm:$0xff]  ;;  %v1449_v6 = vld [vmem:[%s3228_s7 + $0x60] sm:$0xff] }
 0x210   : > { %v2079_v8 = vpop.f32.mrf.mxu1 }
 0x211   : > { %v835_v10 = vadd.f32 %v2079_v8, %v750_v7  ;;  %v1448_v7 = vld [vmem:[%s3228_s7 + $0x58] sm:$0xff]  ;;  %v1447_v8 = vld [vmem:[%s3228_s7 + $0x50] sm:$0xff] }
 0x212   : > { %v825_v12 = vpop.f32.mrf.mxu1 }
 0x213   : > { %v834_v13 = vadd.f32 %v825_v12, %v745_v9  ;;  %v844_v14 = vadd.f32 %v1804_v11, %v835_v10  ;;  %v1446_v9 = vld [vmem:[%s3228_s7 + $0x48] sm:$0xff]  ;;  %v1445_v10 = vld [vmem:[%s3228_s7 + $0x40] sm:$0xff]  ;;  %v1443_v12 = vld [vmem:[%s3228_s7 + $0x30] sm:$0xff] }
 0x215   : > { %v843_v15 = vadd.f32 %v1804_v11, %v834_v13  ;;  %v846_v17 = vmax.f32 %v844_v14, 0.0  ;;  %v1444_v11 = vld [vmem:[%s3228_s7 + $0x38] sm:$0xff]  ;;  %v1442_v13 = vld [vmem:[%s3228_s7 + $0x28] sm:$0xff]  ;;  %v1441_v14 = vld [vmem:[%s3228_s7 + $0x20] sm:$0xff] }
 0x217   : > { %v845_v16 = vmax.f32 %v843_v15, 0.0  ;;  %v1440_v15 = vld [vmem:[%s3228_s7 + $0x18] sm:$0xff] }
 0x219   : > { %2112 = vmatprep.mubr.f32.mxu1 %v845_v16  ;;  %2147 = vmatprep.mubr.f32.mxu0 %v845_v16 }
 0x21a   : > { %2113 = vmatmul.mubr.f32.vlgmr.msra.gmra.mxu1 %v846_v17  ;;  %2148 = vmatmul.mubr.f32.vlgmr.msra.gmra.mxu0 %v846_v17 }
 0x21b   : > { %2151 = vmatpush3.msra.mxu1 %v1836_v2  ;;  %2182 = vmatprep.mubr.f32.mxu1 %v845_v16  ;;  %v1362_v2 = vld [vmem:[#allocation8 + $0x8] sm:$0xff]  ;;  %v1847_v16 = vld [vmem:[%s3228_s7 + $0x98] sm:$0xff] }
 0x21c   : > { %2152 = vmatprep.subr.mxu1 %v1835_v18  ;;  %2189 = vmatprep.mubr.msk.f32.mxu0 %vm671_vm1, %v2817_v23  ;;  %v1830_v23 = vld [vmem:[%s3224_s3 + $0x148] sm:$0xff] }
 0x21d   : > { %2153 = vmatpush3.msra.mxu1 %v1835_v18  ;;  %v1846_v18 = vld [vmem:[%s3228_s7 + $0x90] sm:$0xff] }
 0x21e   : > { %2154 = vmatprep.subr.mxu1 %v1834_v19 }
 0x21f   : > { %2155 = vmatpush3.msra.mxu1 %v1834_v19  ;;  %v1438_v19 = vld [vmem:[%s3228_s7 + $0x8] sm:$0xff] }
 0x220   : > { %2156 = vmatprep.subr.mxu1 %v1833_v20 }
 0x221   : > { %2157 = vmatpush3.msra.mxu1 %v1833_v20  ;;  %v1845_v20 = vld [vmem:[%s3228_s7 + $0x88] sm:$0xff] }
 0x222   : > { %2158 = vmatprep.subr.mxu1 %v1832_v21 }
 0x223   : > { %2159 = vmatpush3.msra.mxu1 %v1832_v21  ;;  %v1437_v21 = vld [vmem:[%s3228_s7] sm:$0xff] }
 0x224   : > { %2160 = vmatprep.subr.mxu1 %v1831_v22 }
 0x225   : > { %2161 = vmatpush3.msra.mxu1 %v1831_v22  ;;  %v1844_v22 = vld [vmem:[%s3228_s7 + $0x80] sm:$0xff] }
 0x226   : > { %2162 = vmatprep.subr.mxu1 %v1830_v23 }
 0x227   : > { %2163 = vmatpush3.msra.mxu1 %v1830_v23 }
 0x228   : > { %2164 = vmatprep.subr.mxu1 %v1829_v24 }
 0x229   : > { %2165 = vmatpush3.msra.mxu1 %v1829_v24 }
 0x22a   : > { %2166 = vmatprep.subr.mxu1 %v1828_v25 }
 0x22b   : > { %2167 = vmatpush3.msra.mxu1 %v1828_v25 }
 0x22c   : > { %2168 = vmatprep.subr.mxu1 %v1827_v26 }
 0x22d   : > { %2169 = vmatpush3.msra.mxu1 %v1827_v26 }
 0x22e   : > { %2170 = vmatprep.subr.mxu1 %v1826_v28 }
 0x22f   : > { %2171 = vmatpush3.msra.mxu1 %v1826_v28 }
 0x230   : > { %2172 = vmatprep.subr.mxu1 %v1825_v29 }
 0x231   : > { %2173 = vmatpush3.msra.mxu1 %v1825_v29 }
 0x232   : > { %2174 = vmatprep.subr.mxu1 %v1824_v31 }
 0x233   : > { %2175 = vmatpush3.msra.mxu1 %v1824_v31 }
 0x234   : > { %2176 = vmatprep.subr.mxu1 %v1823_v32 }
 0x235   : > { %2177 = vmatpush3.msra.mxu1 %v1823_v32 }
 0x236   : > { %2178 = vmatprep.subr.mxu1 %v1822_v33 }
 0x237   : > { %2179 = vmatpush3.msra.mxu1 %v1822_v33 }
 0x238   : > { %2180 = vmatprep.subr.mxu1 %v1821_v34 }
 0x239   : > { %2181 = vmatpush3.msra.mxu1 %v1821_v34 }
 0x23a   : > { %2183 = vmatmul.mubr.f32.vlgmr.msra.gmra.mxu1 %v846_v17  ;;  %2248 = vmatprep.subr.mxu1 %v2587_v39  ;;  %v1439_v17 = vld [vmem:[%s3228_s7 + $0x10] sm:$0xff] }
 0x23b   : > { %2280 = vmatprep.mubr.msk.f32.mxu1 %vm2588_vm2, %v2587_v39 }
 0x2da   : > { %v2114_v35 = vpop.f32.mrf.mxu1  ;;  %v2149_v50 = vpop.f32.mrf.mxu0 }
 0x2db   : > { %2185 = vmatprep.subr.mxu0 %v2114_v35 }
 0x2dc   : > { %v929_v36 = vpop.f32.mrf.mxu1  ;;  %2186 = vmatpush3.msra.mxu0 %v2114_v35  ;;  %v1021_v51 = vpop.f32.mrf.mxu0 }
 0x2dd   : > { %2187 = vmatprep.subr.mxu0 %v929_v36 }
 0x2de   : > { %2188 = vmatpush3.msra.mxu0 %v929_v36 }
 0x2df   : > { %2190 = vmatmul.mubr.msk.f32.vlgmr.msra.gmra.mxu0 %vm671_vm1, %v2826_v30  ;;  %v1858_v30 = vld [vmem:[%s3228_s7 + $0xf0] sm:$0xff] }
 0x2e0   : > { %2196 = vmatprep.mubr.msk.f32.mxu0 %vm671_vm1, %v2822_v27  ;;  %v1859_v27 = vld [vmem:[%s3228_s7 + $0xf8] sm:$0xff] }
 0x2e1   : > { %2249 = vmatpush3.msra.mxu1 %v1859_v27 }
 0x2e2   : > { %2250 = vmatprep.subr.mxu1 %v2587_v39 }
 0x2e3   : > { %2251 = vmatpush3.msra.mxu1 %v1858_v30 }
 0x2e4   : > { %2252 = vmatprep.subr.mxu1 %v2587_v39 }
 0x2e5   : > { %2253 = vmatpush3.msra.mxu1 %v1857_v40 }
 0x2e6   : > { %2254 = vmatprep.subr.mxu1 %v2587_v39 }
 0x2fa   : > { %v2184_v37 = vpop.f32.mrf.mxu1 }
 0x2fb   : > { %2192 = vmatprep.subr.mxu0 %v2184_v37 }
 0x2fc   : > { %v1113_v38 = vpop.f32.mrf.mxu1  ;;  %2193 = vmatpush3.msra.mxu0 %v2184_v37 }
 0x2fd   : > { %2194 = vmatprep.subr.mxu0 %v1113_v38 }
 0x2fe   : > { %2195 = vmatpush3.msra.mxu0 %v1113_v38 }
 0x2ff   : > { %2197 = vmatmul.mubr.msk.f32.vlgmr.msra.gmra.mxu0 %vm671_vm1, %v2854_v41  ;;  %2199 = vmatprep.subr.mxu0 %v2587_v39  ;;  %v1856_v41 = vld [vmem:[%s3228_s7 + $0xe0] sm:$0xff] }
 0x300   : > { %2203 = vmatprep.mubr.msk.f32.mxu0 %vm2588_vm2, %v2587_v39  ;;  %2255 = vmatpush3.msra.mxu1 %v1856_v41 }
 0x301   : > { %2256 = vmatprep.subr.mxu1 %v2587_v39 }
 0x302   : > { %2257 = vmatpush3.msra.mxu1 %v1855_v42 }
 0x303   : > { %2258 = vmatprep.subr.mxu1 %v2587_v39 }
 0x304   : > { %2259 = vmatpush3.msra.mxu1 %v1854_v43 }
 0x305   : > { %2260 = vmatprep.subr.mxu1 %v2587_v39 }
 0x306   : > { %2261 = vmatpush3.msra.mxu1 %v1853_v44 }
 0x307   : > { %2262 = vmatprep.subr.mxu1 %v2587_v39 }
 0x308   : > { %2263 = vmatpush3.msra.mxu1 %v1852_v45 }
 0x309   : > { %2264 = vmatprep.subr.mxu1 %v2587_v39 }
 0x30a   : > { %2265 = vmatpush3.msra.mxu1 %v1851_v46 }
 0x30b   : > { %2266 = vmatprep.subr.mxu1 %v2587_v39 }
 0x30c   : > { %2267 = vmatpush3.msra.mxu1 %v1850_v47 }
 0x30d   : > { %2268 = vmatprep.subr.mxu1 %v2587_v39 }
 0x30e   : > { %2269 = vmatpush3.msra.mxu1 %v1849_v48 }
 0x30f   : > { %2270 = vmatprep.subr.mxu1 %v2587_v39 }
 0x310   : > { %2271 = vmatpush3.msra.mxu1 %v1848_v49 }
 0x311   : > { %2272 = vmatprep.subr.mxu1 %v2587_v39 }
 0x312   : > { %2273 = vmatpush3.msra.mxu1 %v1847_v16 }
 0x313   : > { %2274 = vmatprep.subr.mxu1 %v2587_v39 }
 0x314   : > { %2275 = vmatpush3.msra.mxu1 %v1846_v18 }
 0x315   : > { %2276 = vmatprep.subr.mxu1 %v2587_v39 }
 0x316   : > { %2277 = vmatpush3.msra.mxu1 %v1845_v20 }
 0x317   : > { %2278 = vmatprep.subr.mxu1 %v2587_v39 }
 0x318   : > { %2279 = vmatpush3.msra.mxu1 %v1844_v22 }
 0x39f   : > { %v2191_v52 = vpop.f32.mrf.mxu0 }
 0x3a0   : > { %v1194_v54 = vadd.f32 %v2191_v52, %v2149_v50 }
 0x3a1   : > { %v1188_v53 = vpop.f32.mrf.mxu0 }
 0x3a2   : > { %v1189_v57 = vadd.f32 %v1188_v53, %v1021_v51 }
 0x3bf   : > { %v2198_v55 = vpop.f32.mrf.mxu0 }
 0x3c0   : > { %v1273_v58 = vadd.f32 %v2198_v55, %v1194_v54 }
 0x3c1   : > { %v1263_v59 = vpop.f32.mrf.mxu0 }
 0x3c2   : > { %v1282_v60 = vadd.f32 %v1841_v56, %v1273_v58  ;;  %v1272_v61 = vadd.f32 %v1263_v59, %v1189_v57 }
 0x3c4   : > { %v1284_v62 = vmax.f32 %v1282_v60, 0.0  ;;  %v1281_v63 = vadd.f32 %v1841_v56, %v1272_v61 }
 0x3c6   : > { %1286 = vst [vmem:[%s3048_s18 + $0x8] sm:$0xff] %v1284_v62  ;;  %v1283_v0 = vmax.f32 %v1281_v63, 0.0  ;;  %2200 = vmatpush3.msra.mxu0 %v1284_v62 }
 0x3c7   : > { %2201 = vmatprep.subr.mxu0 %v2587_v39 }
 0x3c8   : > { %1285 = vst [vmem:[%s3048_s18] sm:$0xff] %v1283_v0  ;;  %2202 = vmatpush3.msra.mxu0 %v1283_v0  ;;  %s2483_s18 = scalar_lea.vmem %s2482_s25, 512 }
 0x3c9   : > { %2204 = vmatmul.mubr.msk.f32.vlgmr.msra.gmra.mxu0 %vm671_vm1, %v1287_v1  ;;  %2206 = vmatprep.subr.mxu0 %v2587_v39  ;;  %p2485_p0 = scmp.lt.s32.totalorder %s2483_s18, %s2477_s17 }
 0x3ca   : > { %2207 = vmatpush3.msra.mxu0 %v1284_v62  ;;  %2210 = vmatprep.mubr.msk.f32.mxu0 %vm2588_vm2, %v2587_v39 }
 0x3cb   : > { %2208 = vmatprep.subr.mxu0 %v2587_v39  ;;  %p2486_p2 = por %p2485_p0, %p2484_p13 }
 0x3cc   : > { %2209 = vmatpush3.msra.mxu0 %v1283_v0 }
 0x3cd   : > { %2211 = vmatmul.mubr.msk.f32.vlgmr.msra.gmra.mxu0 %vm671_vm1, %v1362_v2  ;;  %2213 = vmatprep.subr.mxu0 %v2587_v39  ;;  %p2487_p10 = pnand %p2486_p2, %p2480_p9 }
 0x3ce   : > { %2214 = vmatpush3.msra.mxu0 %v1452_v3  ;;  %2245 = vmatprep.mubr.msk.f32.mxu0 %vm2588_vm2, %v2587_v39 }
 0x3cf   : > { %2215 = vmatprep.subr.mxu0 %v2587_v39 }
 0x3d0   : > { %2216 = vmatpush3.msra.mxu0 %v1451_v4 }
 0x3d1   : > { %2217 = vmatprep.subr.mxu0 %v2587_v39 }
 0x3d2   : > { %2218 = vmatpush3.msra.mxu0 %v1450_v5 }
 0x3d3   : > { %2219 = vmatprep.subr.mxu0 %v2587_v39 }
 0x3d4   : > { %2220 = vmatpush3.msra.mxu0 %v1449_v6 }
 0x3d5   : > { %2221 = vmatprep.subr.mxu0 %v2587_v39 }
 0x3d6   : > { %2222 = vmatpush3.msra.mxu0 %v1448_v7 }
 0x3d7   : > { %2223 = vmatprep.subr.mxu0 %v2587_v39 }
 0x3d8   : > { %2224 = vmatpush3.msra.mxu0 %v1447_v8 }
 0x3d9   : > { %2225 = vmatprep.subr.mxu0 %v2587_v39 }
 0x3da   : > { %2226 = vmatpush3.msra.mxu0 %v1446_v9 }
 0x3db   : > { %2227 = vmatprep.subr.mxu0 %v2587_v39 }
 0x3dc   : > { %2228 = vmatpush3.msra.mxu0 %v1445_v10 }
 0x3dd   : > { %2229 = vmatprep.subr.mxu0 %v2587_v39 }
 0x3de   : > { %2230 = vmatpush3.msra.mxu0 %v1444_v11 }
 0x3df   : > { %2231 = vmatprep.subr.mxu0 %v2587_v39 }
 0x3e0   : > { %2232 = vmatpush3.msra.mxu0 %v1443_v12 }
 0x3e1   : > { %2233 = vmatprep.subr.mxu0 %v2587_v39 }
 0x3e2   : > { %2234 = vmatpush3.msra.mxu0 %v1442_v13 }
 0x3e3   : > { %2235 = vmatprep.subr.mxu0 %v2587_v39 }
 0x3e4   : > { %2236 = vmatpush3.msra.mxu0 %v1441_v14 }
 0x3e5   : > { %2237 = vmatprep.subr.mxu0 %v2587_v39 }
 0x3e6   : > { %2238 = vmatpush3.msra.mxu0 %v1440_v15 }
 0x3e7   : > { %2239 = vmatprep.subr.mxu0 %v2587_v39 }
 0x3e8   : > { %2240 = vmatpush3.msra.mxu0 %v1439_v17 }
 0x3e9   : > { %2241 = vmatprep.subr.mxu0 %v2587_v39 }
 0x3ea   : > { %2242 = vmatpush3.msra.mxu0 %v1438_v19 }
 0x3eb   : > { %2243 = vmatprep.subr.mxu0 %v2587_v39 }
 0x3ec   : > { %2244 = vmatpush3.msra.mxu0 %v1437_v21 }
 0x489   : > { %v1357_v23 = vpop.f32.mrf.mxu0 }
 0x48b   : > { %v2205_v24 = vpop.f32.mrf.mxu0 }
 0x48d   : > { %v1432_v25 = vpop.f32.mrf.mxu0 }
 0x48e   : > { %v1436_v26 = vmax.f32 %v1357_v23, %v1432_v25 }
 0x48f   : > { %v2212_v28 = vpop.f32.mrf.mxu0 }
 0x490   : > { %2246 = vmatmul.mubr.f32.vlgmr.msra.gmra.mxu0 %v1436_v26  ;;  %2281 = vmatmul.mubr.f32.vlgmr.msra.gmra.mxu1 %v1436_v26 }
 0x491   : > { %2490 = shalt.err (!%p2487_p10)
}
 0x492   : > { %s2491_s28 = scalar_lea.hbm %s3147_s26, 256  ;;  %s2495_s6 = scalar_lea.hbm %s3229_s8, 512 }
 0x493   : > { %p2492_p6 = scmp.ne.s32.totalorder %s3147_s26, %s2491_s28  ;;  %p2496_p3 = scmp.lt.s32.totalorder %s3147_s26, %s3229_s8 }
 0x494   : > { %p2497_p11 = scmp.lt.s32.totalorder %s2495_s6, %s2491_s28 }
 0x495   : > { %p2493_p4 = pnand %p2492_p6, %p3257_p1 }
 0x496   : > { %p2498_p5 = por %p2497_p11, %p2496_p3 }
 0x497   : > { %p2494_p8 = pneg %p2493_p4 }
 0x499   : > { %p2499_p7 = pnand %p2498_p5, %p2494_p8 }
 0x49b   : > { %2502 = shalt.err (!%p2499_p7)
}
 0x49c   : > { %s2590_s24 = smov 128   ;;  %s2591_s17 = smov 8  }
 0x49d   : > { %2297 = dma.vmem_to_hbm [thread:$0]  (%p3257_p1), %s3141_s21, 256, %s3147_s26, %s1613_s15, %s2590_s24, %s2590_s24, %s2591_s17  }
 0x49e   : > { %s1793_s27 = sshll.u32 %s2790_s5, 3  ;;  %s1864_s25 = sshll.u32 %s2664_s13, 7 }
 0x49f   : > { %s405_s18 = scalar_lea.vmem [#allocation11], %s1793_s27  ;;  %s3177_s6 = scalar_lea.hbm %s3230_s9, %s1864_s25 }
 0x4a0   : > { %s1647_s28 = sshll.u32 %s405_s18, 4  ;;  %s1618_s13 = scalar_lea.sflag [#allocation12], %s2790_s5  ;;  %s3179_s28 = int_to_ptr.vmem [resolvable:$true] %s1647_s28 }
 0x4a1   : > { %s2503_s21 = scalar_lea.vmem %s3179_s28, 128  ;;  %s2592_s26 = smov [#allocation11]  }
 0x4a2   : > { %p2504_p12 = scmp.ne.s32.totalorder %s3179_s28, %s2503_s21  ;;  %s2507_s15 = sshll.u32 %s2592_s26, 4  ;;  %s2508_s15 = int_to_ptr.vmem [resolvable:$false] %s2507_s15 }
 0x4a3   : > { %s2509_s1 = scalar_lea.vmem %s2508_s15, 256  ;;  %p2510_p0 = scmp.lt.s32.totalorder %s3179_s28, %s2508_s15 }
 0x4a4   : > { %p2505_p9 = pnand %p2504_p12, %p3257_p1  ;;  %p2511_p2 = scmp.lt.s32.totalorder %s2509_s1, %s2503_s21 }
 0x4a6   : > { %p2506_p13 = pneg %p2505_p9  ;;  %p2512_p10 = por %p2511_p2, %p2510_p0 }
 0x4a8   : > { %p2513_p6 = pnand %p2512_p10, %p2506_p13 }
 0x550   : > { %v1519_v29 = vpop.f32.mrf.mxu0  ;;  %v1606_v31 = vpop.f32.mrf.mxu1 }
 0x551   : > { %v1610_v32 = vmax.f32 %v1519_v29, %v1606_v31 }
 0x552   : > { %v2247_v33 = vpop.f32.mrf.mxu0  ;;  %v2282_v34 = vpop.f32.mrf.mxu1 }
 0x553   : > { %1611 = vst.msk [vmem:[%s405_s18] sm:$0xff] %vm421_vm0, %v1610_v32 }
 0x554   : > { %2516 = shalt.err (!%p2513_p6)
}
 0x555   : > { %s2517_s19 = scalar_lea.hbm %s3177_s6, 128  ;;  %s2521_s17 = scalar_lea.hbm %s3230_s9, 256 }
 0x556   : > { %p2518_p4 = scmp.ne.s32.totalorder %s3177_s6, %s2517_s19  ;;  %p2522_p11 = scmp.lt.s32.totalorder %s3177_s6, %s3230_s9 }
 0x557   : > { %p2523_p5 = scmp.lt.s32.totalorder %s2521_s17, %s2517_s19 }
 0x558   : > { %p2519_p8 = pnand %p2518_p4, %p3257_p1 }
 0x559   : > { %p2524_p7 = por %p2523_p5, %p2522_p11 }
 0x55a   : > { %p2520_p3 = pneg %p2519_p8 }
 0x55c   : > { %p2525_p12 = pnand %p2524_p7, %p2520_p3 }
 0x55e   : > { %2528 = shalt.err (!%p2525_p12)
}
 0x55f   : > { %2298 = dma.vmem_to_hbm [thread:$0]  (%p3257_p1), %s3179_s28, 128, %s3177_s6, %s1618_s13  }
 0x560 PF: > { %s1659_s18 = sand.u32 1, %s2567_s30   ;;  %p3258_p9 = scmp.ne.s32.totalorder %s3241_s16, 0 }
 0x561   : > { %p3259_p13 = scmp.ge.s32.totalorder %s2579_s12, 2  ;;  %s1660_s23 = scalar_lea.sflag [#allocation4], %s1659_s18 }
 0x563   : > { %p2316_p0 = pnand %p3259_p13, %p3258_p9 }
 0x565   : > { %p2317_p2 = pneg %p2316_p0 }
 0x567   : > { %2558 = dma.done.wait (%p2317_p2), %s1660_s23, 256  }
 0x568   : > { %2560 = vsyncadd (%p2317_p2), %s1660_s23, 4294967040  ;;  %s1669_s20 = scalar_lea.sflag [#allocation12], %s1659_s18 }
 0x569   : > { %2562 = dma.done.wait (%p2317_p2), %s1669_s20, 128  }
 0x56a   : > { %2564 = vsyncadd (%p2317_p2), %s1669_s20, 4294967168  ;;  %p28_p1 = scmp.ge.s32.totalorder %s2732_s22, 4   ;;  %s3260_s30 = smov %s2571_s10 }
 0x56b   : > { %s3261_s10 = smov %s2575_s11  ;;  %s3262_s11 = smov %s2742_s29 }
 0x56c   : > { %s3263_s12 = smov %s2732_s22  ;;  %30 = sbr.rel (!%p28_p1) target bundleno = 13 (0xd), region = 133 }
 0x571   :  { %1674 = vsyncpa [#allocation3], 1 }
 0x572   :  { %1676 = vsyncpa [#allocation3 + $0x1], 1 }
 0x573   :  { %1677 = vsyncpa [#allocation6], 1 }
 0x574   :  { %1678 = vsyncpa [#allocation9], 1 }
 0x575   :  { %1679 = vsyncpa [#allocation4], 1 }
 0x576   :  { %1681 = vsyncpa [#allocation4 + $0x1], 1 }
 0x577   :  { %1682 = vsyncpa [#allocation12], 1 }
 0x578   :  { %1684 = vsyncpa [#allocation12 + $0x1], 1 }

</bundles_post_ra>
